<compile_context>
chip_gen: v6e
topology: v6e:2x2x1
jax: 0.10.0
libtpu: 0.0.40
codegen_flags: <defaults>
</compile_context>

<pallas_src>
import numpy as np

import jax
import jax.numpy as jnp
from jax import lax
from jax.experimental import pallas as pl
from jax.experimental.pallas import tpu as pltpu

# ---------------- model hyper-parameters (args.*) ----------------
VOCAB_SIZE = 20
EMBEDDING_SIZE = 16     # args.embedding_size
HIDDEN_SIZE = 32        # args.lstm_hidden_size
NUM_LAYERS = 2          # args.num_lstm_layers
SEQ_LEN = 8             # number of tokens produced by tokenize(node)

PAD_V = ((VOCAB_SIZE + 7) // 8) * 8          # sublane-aligned vocab rows (24)


# ---------------- fused Pallas kernel: embedding + wavefront LSTM ----------------
def make_node_nn_kernel(num_layers, seq, hidden, vocab):
    """Fused kernel.

    Inputs (whole arrays, VMEM resident):
      idx_ref  : (seq+L-1, 1) int32   token indices, padded with `vocab`
      slab_ref : (PAD_V + 8 + L*H, 4*L*H) f32 packed parameters
                   rows [0, PAD_V)            : embedding-folded layer-0 input
                                                projection (layer-0 gate cols)
                   row  PAD_V                  : combined bias, all layers
                   rows [PAD_V+8, PAD_V+8+L*H) : fused recurrent rhs R
      out_ref  : (1, H) f32           final hidden of the last layer
    Gate-column layout (width 4*L*H): [ I | F | G | O ], each group L*H wide and
    packed [layer0 | layer1 | ...] inside, so the packed hidden state (1, L*H)
    multiplies R directly and i/g gate slices are vreg-aligned.
    """
    L, H = num_layers, hidden
    LH = L * H
    G = 4 * LH
    rows = seq + L - 1           # number of wavefront supersteps

    def kernel(idx_ref, slab_ref, out_ref):
        # ---- unpack the parameter slab (once) ----
        wfold = slab_ref[0:PAD_V, :]                           # (PAD_V, G)
        bias = slab_ref[PAD_V:PAD_V + 1, :]                    # (1, G)
        r_mat = slab_ref[PAD_V + 8:PAD_V + 8 + LH, :]          # (LH, G)

        # ---- precompute the additive gate term for every superstep ----
        # one-hot gather of the folded (embedding @ Wih0) table; padded rows of
        # the index vector hit an all-zero slab row -> contribute nothing.
        colv = lax.broadcasted_iota(jnp.int32, (rows, PAD_V), 1)
        onehot = (idx_ref[...] == colv).astype(jnp.float32)    # (rows, PAD_V)
        pre = jnp.dot(onehot, wfold,
                      preferred_element_type=jnp.float32) + bias   # (rows, G)

        # lane masks for the single-tanh activation:
        #   sigmoid(x) = 0.5 * (tanh(x/2) + 1)   for the i/f/o groups
        #   tanh(x)                              for the g group (lanes [2LH,3LH))
        lane = lax.broadcasted_iota(jnp.int32, (1, G), 1)
        is_g = (lane >= 2 * LH) & (lane < 3 * LH)
        scale = jnp.where(is_g, 1.0, 0.5).astype(jnp.float32)  # pre-scale == affine scale
        shift = jnp.where(is_g, 0.0, 0.5).astype(jnp.float32)

        lane_s = lax.broadcasted_iota(jnp.int32, (1, LH), 1)

        # packed state across layers: h = [h_0, ..., h_{L-1}], same for c
        h = jnp.zeros((1, LH), jnp.float32)
        c = jnp.zeros((1, LH), jnp.float32)

        for s in range(rows):                 # fixed trip count -> fully unrolled
            if s == 0:
                gates = pre[0:1, :]           # state is zero: skip the matmul
            else:
                gates = pre[s:s + 1, :] + jnp.dot(
                    h, r_mat, preferred_element_type=jnp.float32)   # (1, G)

            t = jnp.tanh(gates * scale)       # single 256-lane EUP pass
            act = t * scale + shift           # sigmoid for i/f/o, tanh for g

            i_g = act[:, 0 * LH:1 * LH]       # vreg-aligned slice
            f_g = act[:, 1 * LH:2 * LH]       # one lane rotate
            g_g = act[:, 2 * LH:3 * LH]       # vreg-aligned slice
            o_g = act[:, 3 * LH:4 * LH]       # one lane rotate

            c = f_g * c + i_g * g_g
            h = o_g * jnp.tanh(c)

            if s < L - 1:
                # layers that have not started yet must keep zero state
                keep = lane_s < (s + 1) * H
                h = jnp.where(keep, h, 0.0)
                c = jnp.where(keep, c, 0.0)

        out_ref[...] = h[:, (L - 1) * H:L * H]   # final hidden of the last layer

    return kernel


# ---------------- parameter packing (input-independent, done once) ----------------
def pack_params(params):
    """Pack embedding + per-layer LSTM weights into one lane-padded f32 slab."""
    L, H, V = NUM_LAYERS, HIDDEN_SIZE, VOCAB_SIZE
    LH = L * H
    G = 4 * LH

    def cols(gate, layer):
        start = gate * LH + layer * H
        return slice(start, start + H)

    # fused recurrent rhs: rows = packed hidden [h0 | h1 | ...]
    r_mat = np.zeros((LH, G), np.float32)
    for l in range(L):
        wih_t = np.asarray(params[f"wih_t_{l}"], np.float32)   # (in_dim, 4H)
        whh_t = np.asarray(params[f"whh_t_{l}"], np.float32)   # (H, 4H)
        for g in range(4):
            r_mat[l * H:(l + 1) * H, cols(g, l)] = whh_t[:, g * H:(g + 1) * H]
            if l >= 1:   # layer-l input is layer-(l-1) hidden
                r_mat[(l - 1) * H:l * H, cols(g, l)] = wih_t[:, g * H:(g + 1) * H]

    # embedding folded into layer-0 input projection (vocab, 4H) -> slab layout
    emb = np.asarray(params["embedding"], np.float32)           # (V, E)
    w0fold = emb @ np.asarray(params["wih_t_0"], np.float32)    # (V, 4H)
    wfold = np.zeros((PAD_V, G), np.float32)
    for g in range(4):
        wfold[:V, cols(g, 0)] = w0fold[:, g * H:(g + 1) * H]

    # combined biases (b_ih + b_hh) for every layer, in the fused column layout
    bias = np.zeros((8, G), np.float32)
    for l in range(L):
        b = np.asarray(params[f"bias_{l}"], np.float32)[0]      # (4H,)
        for g in range(4):
            bias[0, cols(g, l)] = b[g * H:(g + 1) * H]

    slab = np.concatenate([wfold, bias, r_mat], axis=0)          # (PAD_V+8+LH, G)
    return jnp.asarray(slab)


# ---------------- NodeNN forward (single pallas_call) ----------------
@jax.jit
def node_nn_forward(indices, slab):
    """Equivalent of NodeNN.forward: embed tokens, run LSTM, return h_n[-1, :]."""
    rows = SEQ_LEN + NUM_LAYERS - 1
    # pad index sequence for the wavefront tail; pad value hits a zero slab row
    idx = jnp.full((rows,), VOCAB_SIZE, jnp.int32)
    idx = idx.at[:SEQ_LEN].set(indices.astype(jnp.int32))
    idx2d = idx.reshape(rows, 1)

    kernel = make_node_nn_kernel(NUM_LAYERS, SEQ_LEN, HIDDEN_SIZE, VOCAB_SIZE)
    h_last = pl.pallas_call(
        kernel,
        out_shape=jax.ShapeDtypeStruct((1, HIDDEN_SIZE), jnp.float32),
        in_specs=[pl.BlockSpec(memory_space=pltpu.MemorySpace.VMEM)] * 2,
        out_specs=pl.BlockSpec(memory_space=pltpu.MemorySpace.VMEM),
    )(idx2d, slab)
    return h_last[0]                                             # (H,)


# ---------------- pure-JAX reference (for correctness check) ----------------
def lstm_layer_ref(x_seq, wih_t, whh_t, b):
    H = whh_t.shape[0]

    def step(carry, x_t):
        h, c = carry
        gates = x_t @ wih_t + h @ whh_t + b[0]
        i_g = jax.nn.sigmoid(gates[0 * H:1 * H])
        f_g = jax.nn.sigmoid(gates[1 * H:2 * H])
        g_g = jnp.tanh(gates[2 * H:3 * H])
        o_g = jax.nn.sigmoid(gates[3 * H:4 * H])
        c_new = f_g * c + i_g * g_g
        h_new = o_g * jnp.tanh(c_new)
        return (h_new, c_new), h_new

    init = (jnp.zeros((H,), jnp.float32), jnp.zeros((H,), jnp.float32))
    (h_last, _), h_seq = lax.scan(step, init, x_seq)
    return h_seq, h_last


def node_nn_forward_ref(indices, params):
    x = params["embedding"][indices]
    h_last = None
    for layer in range(NUM_LAYERS):
        x, h_last = lstm_layer_ref(
            x, params[f"wih_t_{layer}"], params[f"whh_t_{layer}"], params[f"bias_{layer}"]
        )
    return h_last


# ---------------- deterministic parameter init (PyTorch-style) ----------------
def init_params(key):
    params = {}
    k_emb, key = jax.random.split(key)
    # nn.Embedding default init: N(0, 1)
    params["embedding"] = jax.random.normal(k_emb, (VOCAB_SIZE, EMBEDDING_SIZE), jnp.float32)

    bound = 1.0 / np.sqrt(HIDDEN_SIZE)   # nn.LSTM default: U(-1/sqrt(H), 1/sqrt(H))
    for layer in range(NUM_LAYERS):
        in_dim = EMBEDDING_SIZE if layer == 0 else HIDDEN_SIZE
        k1, k2, k3, k4, key = jax.random.split(key, 5)
        w_ih = jax.random.uniform(k1, (4 * HIDDEN_SIZE, in_dim), jnp.float32, -bound, bound)
        w_hh = jax.random.uniform(k2, (4 * HIDDEN_SIZE, HIDDEN_SIZE), jnp.float32, -bound, bound)
        b_ih = jax.random.uniform(k3, (4 * HIDDEN_SIZE,), jnp.float32, -bound, bound)
        b_hh = jax.random.uniform(k4, (4 * HIDDEN_SIZE,), jnp.float32, -bound, bound)
        params[f"wih_t_{layer}"] = w_ih.T                          # (in_dim, 4H)
        params[f"whh_t_{layer}"] = w_hh.T                          # (H, 4H)
        params[f"bias_{layer}"] = (b_ih + b_hh).reshape(1, -1)     # (1, 4H)
    return params


if __name__ == "__main__":
    key = jax.random.PRNGKey(0)
    k_params, k_idx = jax.random.split(key)
    params = init_params(k_params)
    slab = pack_params(params)      # one-time parameter packing (embedding folded in)

    # Token-index sequence standing in for `tokenize(node, self.vocab)` indices.
    indices = jax.random.randint(k_idx, (SEQ_LEN,), 0, VOCAB_SIZE, dtype=jnp.int32)

    out = node_nn_forward(indices, slab)
    out = jax.block_until_ready(out)

    ref = node_nn_forward_ref(indices, params)
    np.testing.assert_allclose(np.asarray(out), np.asarray(ref), rtol=1e-3, atol=1e-3)
    assert out.shape == (HIDDEN_SIZE,)

    print("KERNEL_OK")
</pallas_src>

<mosaic_0001>
module attributes {stable_mosaic.version = 11 : i64} {
  func.func @kernel(%arg0: memref<9x1xi32, #tpu.memory_space<vmem>>, %arg1: memref<96x256xf32, #tpu.memory_space<vmem>>, %arg2: memref<1x32xf32, #tpu.memory_space<vmem>>) attributes {dimension_semantics = [], scalar_prefetch = 0 : i64, scratch_operands = 0 : i64, tpu.core_type = #tpu.core_type<tc>} {
    %c0 = arith.constant 0 : index
    %c0_0 = arith.constant 0 : index
    %0 = vector.load %arg1[%c0, %c0_0] : memref<96x256xf32, #tpu.memory_space<vmem>>, vector<24x256xf32>
    %c24 = arith.constant 24 : index
    %c0_1 = arith.constant 0 : index
    %1 = vector.load %arg1[%c24, %c0_1] : memref<96x256xf32, #tpu.memory_space<vmem>>, vector<1x256xf32>
    %c32 = arith.constant 32 : index
    %c0_2 = arith.constant 0 : index
    %2 = vector.load %arg1[%c32, %c0_2] : memref<96x256xf32, #tpu.memory_space<vmem>>, vector<64x256xf32>
    %3 = tpu.iota {dimensions = array<i32: 1>} : vector<9x24xi32>
    %c0_3 = arith.constant 0 : index
    %c0_4 = arith.constant 0 : index
    %4 = vector.load %arg0[%c0_3, %c0_4] : memref<9x1xi32, #tpu.memory_space<vmem>>, vector<9x1xi32>
    %5 = vector.broadcast %4 : vector<9x1xi32> to vector<9x24xi32>
    %6 = arith.cmpi eq, %5, %3 : vector<9x24xi32>
    %7 = arith.extui %6 : vector<9x24xi1> to vector<9x24xi32>
    %8 = arith.sitofp %7 : vector<9x24xi32> to vector<9x24xf32>
    %cst = arith.constant dense<0.000000e+00> : vector<9x256xf32>
    %9 = tpu.matmul %8, %0, %cst {dimension_numbers = #tpu.dot_dimension_numbers<[1], [0], [0], [1], [0, 0, 1, 1], [], []>} : vector<9x24xf32>, vector<24x256xf32>, vector<9x256xf32> -> vector<9x256xf32>
    %10 = vector.broadcast %1 : vector<1x256xf32> to vector<9x256xf32>
    %11 = arith.addf %9, %10 : vector<9x256xf32>
    %12 = tpu.iota {dimensions = array<i32: 1>} : vector<1x256xi32>
    %c128_i32 = arith.constant 128 : i32
    %13 = vector.broadcast %c128_i32 : i32 to vector<1x256xi32>
    %14 = arith.cmpi sge, %12, %13 : vector<1x256xi32>
    %c192_i32 = arith.constant 192 : i32
    %15 = vector.broadcast %c192_i32 : i32 to vector<1x256xi32>
    %16 = arith.cmpi slt, %12, %15 : vector<1x256xi32>
    %17 = arith.andi %14, %16 : vector<1x256xi1>
    %cst_5 = arith.constant 1.000000e+00 : f32
    %cst_6 = arith.constant 5.000000e-01 : f32
    %18 = vector.broadcast %cst_5 : f32 to vector<1x256xf32>
    %19 = vector.broadcast %cst_6 : f32 to vector<1x256xf32>
    %20 = arith.select %17, %18, %19 : vector<1x256xi1>, vector<1x256xf32>
    %cst_7 = arith.constant 0.000000e+00 : f32
    %cst_8 = arith.constant 5.000000e-01 : f32
    %21 = vector.broadcast %cst_7 : f32 to vector<1x256xf32>
    %22 = vector.broadcast %cst_8 : f32 to vector<1x256xf32>
    %23 = arith.select %17, %21, %22 : vector<1x256xi1>, vector<1x256xf32>
    %24 = tpu.iota {dimensions = array<i32: 1>} : vector<1x64xi32>
    %cst_9 = arith.constant 0.000000e+00 : f32
    %25 = vector.broadcast %cst_9 : f32 to vector<1x64xf32>
    %26 = vector.extract_strided_slice %11 {offsets = [0, 0], sizes = [1, 256], strides = [1, 1]} : vector<9x256xf32> to vector<1x256xf32>
    %27 = arith.mulf %26, %20 : vector<1x256xf32>
    %28 = math.tanh %27 : vector<1x256xf32>
    %29 = arith.mulf %28, %20 : vector<1x256xf32>
    %30 = arith.addf %29, %23 : vector<1x256xf32>
    %31 = vector.extract_strided_slice %30 {offsets = [0, 0], sizes = [1, 64], strides = [1, 1]} : vector<1x256xf32> to vector<1x64xf32>
    %32 = vector.extract_strided_slice %30 {offsets = [0, 64], sizes = [1, 64], strides = [1, 1]} : vector<1x256xf32> to vector<1x64xf32>
    %33 = vector.extract_strided_slice %30 {offsets = [0, 128], sizes = [1, 64], strides = [1, 1]} : vector<1x256xf32> to vector<1x64xf32>
    %34 = vector.extract_strided_slice %30 {offsets = [0, 192], sizes = [1, 64], strides = [1, 1]} : vector<1x256xf32> to vector<1x64xf32>
    %35 = arith.mulf %32, %25 : vector<1x64xf32>
    %36 = arith.mulf %31, %33 : vector<1x64xf32>
    %37 = arith.addf %35, %36 : vector<1x64xf32>
    %38 = math.tanh %37 : vector<1x64xf32>
    %39 = arith.mulf %34, %38 : vector<1x64xf32>
    %c32_i32 = arith.constant 32 : i32
    %40 = vector.broadcast %c32_i32 : i32 to vector<1x64xi32>
    %41 = arith.cmpi slt, %24, %40 : vector<1x64xi32>
    %cst_10 = arith.constant 0.000000e+00 : f32
    %42 = vector.broadcast %cst_10 : f32 to vector<1x64xf32>
    %43 = arith.select %41, %39, %42 : vector<1x64xi1>, vector<1x64xf32>
    %cst_11 = arith.constant 0.000000e+00 : f32
    %44 = vector.broadcast %cst_11 : f32 to vector<1x64xf32>
    %45 = arith.select %41, %37, %44 : vector<1x64xi1>, vector<1x64xf32>
    %46 = vector.extract_strided_slice %11 {offsets = [1, 0], sizes = [1, 256], strides = [1, 1]} : vector<9x256xf32> to vector<1x256xf32>
    %cst_12 = arith.constant dense<0.000000e+00> : vector<1x256xf32>
    %47 = tpu.matmul %43, %2, %cst_12 {dimension_numbers = #tpu.dot_dimension_numbers<[1], [0], [0], [1], [0, 0, 1, 1], [], []>} : vector<1x64xf32>, vector<64x256xf32>, vector<1x256xf32> -> vector<1x256xf32>
    %48 = arith.addf %46, %47 : vector<1x256xf32>
    %49 = arith.mulf %48, %20 : vector<1x256xf32>
    %50 = math.tanh %49 : vector<1x256xf32>
    %51 = arith.mulf %50, %20 : vector<1x256xf32>
    %52 = arith.addf %51, %23 : vector<1x256xf32>
    %53 = vector.extract_strided_slice %52 {offsets = [0, 0], sizes = [1, 64], strides = [1, 1]} : vector<1x256xf32> to vector<1x64xf32>
    %54 = vector.extract_strided_slice %52 {offsets = [0, 64], sizes = [1, 64], strides = [1, 1]} : vector<1x256xf32> to vector<1x64xf32>
    %55 = vector.extract_strided_slice %52 {offsets = [0, 128], sizes = [1, 64], strides = [1, 1]} : vector<1x256xf32> to vector<1x64xf32>
    %56 = vector.extract_strided_slice %52 {offsets = [0, 192], sizes = [1, 64], strides = [1, 1]} : vector<1x256xf32> to vector<1x64xf32>
    %57 = arith.mulf %54, %45 : vector<1x64xf32>
    %58 = arith.mulf %53, %55 : vector<1x64xf32>
    %59 = arith.addf %57, %58 : vector<1x64xf32>
    %60 = math.tanh %59 : vector<1x64xf32>
    %61 = arith.mulf %56, %60 : vector<1x64xf32>
    %62 = vector.extract_strided_slice %11 {offsets = [2, 0], sizes = [1, 256], strides = [1, 1]} : vector<9x256xf32> to vector<1x256xf32>
    %cst_13 = arith.constant dense<0.000000e+00> : vector<1x256xf32>
    %63 = tpu.matmul %61, %2, %cst_13 {dimension_numbers = #tpu.dot_dimension_numbers<[1], [0], [0], [1], [0, 0, 1, 1], [], []>} : vector<1x64xf32>, vector<64x256xf32>, vector<1x256xf32> -> vector<1x256xf32>
    %64 = arith.addf %62, %63 : vector<1x256xf32>
    %65 = arith.mulf %64, %20 : vector<1x256xf32>
    %66 = math.tanh %65 : vector<1x256xf32>
    %67 = arith.mulf %66, %20 : vector<1x256xf32>
    %68 = arith.addf %67, %23 : vector<1x256xf32>
    %69 = vector.extract_strided_slice %68 {offsets = [0, 0], sizes = [1, 64], strides = [1, 1]} : vector<1x256xf32> to vector<1x64xf32>
    %70 = vector.extract_strided_slice %68 {offsets = [0, 64], sizes = [1, 64], strides = [1, 1]} : vector<1x256xf32> to vector<1x64xf32>
    %71 = vector.extract_strided_slice %68 {offsets = [0, 128], sizes = [1, 64], strides = [1, 1]} : vector<1x256xf32> to vector<1x64xf32>
    %72 = vector.extract_strided_slice %68 {offsets = [0, 192], sizes = [1, 64], strides = [1, 1]} : vector<1x256xf32> to vector<1x64xf32>
    %73 = arith.mulf %70, %59 : vector<1x64xf32>
    %74 = arith.mulf %69, %71 : vector<1x64xf32>
    %75 = arith.addf %73, %74 : vector<1x64xf32>
    %76 = math.tanh %75 : vector<1x64xf32>
    %77 = arith.mulf %72, %76 : vector<1x64xf32>
    %78 = vector.extract_strided_slice %11 {offsets = [3, 0], sizes = [1, 256], strides = [1, 1]} : vector<9x256xf32> to vector<1x256xf32>
    %cst_14 = arith.constant dense<0.000000e+00> : vector<1x256xf32>
    %79 = tpu.matmul %77, %2, %cst_14 {dimension_numbers = #tpu.dot_dimension_numbers<[1], [0], [0], [1], [0, 0, 1, 1], [], []>} : vector<1x64xf32>, vector<64x256xf32>, vector<1x256xf32> -> vector<1x256xf32>
    %80 = arith.addf %78, %79 : vector<1x256xf32>
    %81 = arith.mulf %80, %20 : vector<1x256xf32>
    %82 = math.tanh %81 : vector<1x256xf32>
    %83 = arith.mulf %82, %20 : vector<1x256xf32>
    %84 = arith.addf %83, %23 : vector<1x256xf32>
    %85 = vector.extract_strided_slice %84 {offsets = [0, 0], sizes = [1, 64], strides = [1, 1]} : vector<1x256xf32> to vector<1x64xf32>
    %86 = vector.extract_strided_slice %84 {offsets = [0, 64], sizes = [1, 64], strides = [1, 1]} : vector<1x256xf32> to vector<1x64xf32>
    %87 = vector.extract_strided_slice %84 {offsets = [0, 128], sizes = [1, 64], strides = [1, 1]} : vector<1x256xf32> to vector<1x64xf32>
    %88 = vector.extract_strided_slice %84 {offsets = [0, 192], sizes = [1, 64], strides = [1, 1]} : vector<1x256xf32> to vector<1x64xf32>
    %89 = arith.mulf %86, %75 : vector<1x64xf32>
    %90 = arith.mulf %85, %87 : vector<1x64xf32>
    %91 = arith.addf %89, %90 : vector<1x64xf32>
    %92 = math.tanh %91 : vector<1x64xf32>
    %93 = arith.mulf %88, %92 : vector<1x64xf32>
    %94 = vector.extract_strided_slice %11 {offsets = [4, 0], sizes = [1, 256], strides = [1, 1]} : vector<9x256xf32> to vector<1x256xf32>
    %cst_15 = arith.constant dense<0.000000e+00> : vector<1x256xf32>
    %95 = tpu.matmul %93, %2, %cst_15 {dimension_numbers = #tpu.dot_dimension_numbers<[1], [0], [0], [1], [0, 0, 1, 1], [], []>} : vector<1x64xf32>, vector<64x256xf32>, vector<1x256xf32> -> vector<1x256xf32>
    %96 = arith.addf %94, %95 : vector<1x256xf32>
    %97 = arith.mulf %96, %20 : vector<1x256xf32>
    %98 = math.tanh %97 : vector<1x256xf32>
    %99 = arith.mulf %98, %20 : vector<1x256xf32>
    %100 = arith.addf %99, %23 : vector<1x256xf32>
    %101 = vector.extract_strided_slice %100 {offsets = [0, 0], sizes = [1, 64], strides = [1, 1]} : vector<1x256xf32> to vector<1x64xf32>
    %102 = vector.extract_strided_slice %100 {offsets = [0, 64], sizes = [1, 64], strides = [1, 1]} : vector<1x256xf32> to vector<1x64xf32>
    %103 = vector.extract_strided_slice %100 {offsets = [0, 128], sizes = [1, 64], strides = [1, 1]} : vector<1x256xf32> to vector<1x64xf32>
    %104 = vector.extract_strided_slice %100 {offsets = [0, 192], sizes = [1, 64], strides = [1, 1]} : vector<1x256xf32> to vector<1x64xf32>
    %105 = arith.mulf %102, %91 : vector<1x64xf32>
    %106 = arith.mulf %101, %103 : vector<1x64xf32>
    %107 = arith.addf %105, %106 : vector<1x64xf32>
    %108 = math.tanh %107 : vector<1x64xf32>
    %109 = arith.mulf %104, %108 : vector<1x64xf32>
    %110 = vector.extract_strided_slice %11 {offsets = [5, 0], sizes = [1, 256], strides = [1, 1]} : vector<9x256xf32> to vector<1x256xf32>
    %cst_16 = arith.constant dense<0.000000e+00> : vector<1x256xf32>
    %111 = tpu.matmul %109, %2, %cst_16 {dimension_numbers = #tpu.dot_dimension_numbers<[1], [0], [0], [1], [0, 0, 1, 1], [], []>} : vector<1x64xf32>, vector<64x256xf32>, vector<1x256xf32> -> vector<1x256xf32>
    %112 = arith.addf %110, %111 : vector<1x256xf32>
    %113 = arith.mulf %112, %20 : vector<1x256xf32>
    %114 = math.tanh %113 : vector<1x256xf32>
    %115 = arith.mulf %114, %20 : vector<1x256xf32>
    %116 = arith.addf %115, %23 : vector<1x256xf32>
    %117 = vector.extract_strided_slice %116 {offsets = [0, 0], sizes = [1, 64], strides = [1, 1]} : vector<1x256xf32> to vector<1x64xf32>
    %118 = vector.extract_strided_slice %116 {offsets = [0, 64], sizes = [1, 64], strides = [1, 1]} : vector<1x256xf32> to vector<1x64xf32>
    %119 = vector.extract_strided_slice %116 {offsets = [0, 128], sizes = [1, 64], strides = [1, 1]} : vector<1x256xf32> to vector<1x64xf32>
    %120 = vector.extract_strided_slice %116 {offsets = [0, 192], sizes = [1, 64], strides = [1, 1]} : vector<1x256xf32> to vector<1x64xf32>
    %121 = arith.mulf %118, %107 : vector<1x64xf32>
    %122 = arith.mulf %117, %119 : vector<1x64xf32>
    %123 = arith.addf %121, %122 : vector<1x64xf32>
    %124 = math.tanh %123 : vector<1x64xf32>
    %125 = arith.mulf %120, %124 : vector<1x64xf32>
    %126 = vector.extract_strided_slice %11 {offsets = [6, 0], sizes = [1, 256], strides = [1, 1]} : vector<9x256xf32> to vector<1x256xf32>
    %cst_17 = arith.constant dense<0.000000e+00> : vector<1x256xf32>
    %127 = tpu.matmul %125, %2, %cst_17 {dimension_numbers = #tpu.dot_dimension_numbers<[1], [0], [0], [1], [0, 0, 1, 1], [], []>} : vector<1x64xf32>, vector<64x256xf32>, vector<1x256xf32> -> vector<1x256xf32>
    %128 = arith.addf %126, %127 : vector<1x256xf32>
    %129 = arith.mulf %128, %20 : vector<1x256xf32>
    %130 = math.tanh %129 : vector<1x256xf32>
    %131 = arith.mulf %130, %20 : vector<1x256xf32>
    %132 = arith.addf %131, %23 : vector<1x256xf32>
    %133 = vector.extract_strided_slice %132 {offsets = [0, 0], sizes = [1, 64], strides = [1, 1]} : vector<1x256xf32> to vector<1x64xf32>
    %134 = vector.extract_strided_slice %132 {offsets = [0, 64], sizes = [1, 64], strides = [1, 1]} : vector<1x256xf32> to vector<1x64xf32>
    %135 = vector.extract_strided_slice %132 {offsets = [0, 128], sizes = [1, 64], strides = [1, 1]} : vector<1x256xf32> to vector<1x64xf32>
    %136 = vector.extract_strided_slice %132 {offsets = [0, 192], sizes = [1, 64], strides = [1, 1]} : vector<1x256xf32> to vector<1x64xf32>
    %137 = arith.mulf %134, %123 : vector<1x64xf32>
    %138 = arith.mulf %133, %135 : vector<1x64xf32>
    %139 = arith.addf %137, %138 : vector<1x64xf32>
    %140 = math.tanh %139 : vector<1x64xf32>
    %141 = arith.mulf %136, %140 : vector<1x64xf32>
    %142 = vector.extract_strided_slice %11 {offsets = [7, 0], sizes = [1, 256], strides = [1, 1]} : vector<9x256xf32> to vector<1x256xf32>
    %cst_18 = arith.constant dense<0.000000e+00> : vector<1x256xf32>
    %143 = tpu.matmul %141, %2, %cst_18 {dimension_numbers = #tpu.dot_dimension_numbers<[1], [0], [0], [1], [0, 0, 1, 1], [], []>} : vector<1x64xf32>, vector<64x256xf32>, vector<1x256xf32> -> vector<1x256xf32>
    %144 = arith.addf %142, %143 : vector<1x256xf32>
    %145 = arith.mulf %144, %20 : vector<1x256xf32>
    %146 = math.tanh %145 : vector<1x256xf32>
    %147 = arith.mulf %146, %20 : vector<1x256xf32>
    %148 = arith.addf %147, %23 : vector<1x256xf32>
    %149 = vector.extract_strided_slice %148 {offsets = [0, 0], sizes = [1, 64], strides = [1, 1]} : vector<1x256xf32> to vector<1x64xf32>
    %150 = vector.extract_strided_slice %148 {offsets = [0, 64], sizes = [1, 64], strides = [1, 1]} : vector<1x256xf32> to vector<1x64xf32>
    %151 = vector.extract_strided_slice %148 {offsets = [0, 128], sizes = [1, 64], strides = [1, 1]} : vector<1x256xf32> to vector<1x64xf32>
    %152 = vector.extract_strided_slice %148 {offsets = [0, 192], sizes = [1, 64], strides = [1, 1]} : vector<1x256xf32> to vector<1x64xf32>
    %153 = arith.mulf %150, %139 : vector<1x64xf32>
    %154 = arith.mulf %149, %151 : vector<1x64xf32>
    %155 = arith.addf %153, %154 : vector<1x64xf32>
    %156 = math.tanh %155 : vector<1x64xf32>
    %157 = arith.mulf %152, %156 : vector<1x64xf32>
    %158 = vector.extract_strided_slice %11 {offsets = [8, 0], sizes = [1, 256], strides = [1, 1]} : vector<9x256xf32> to vector<1x256xf32>
    %cst_19 = arith.constant dense<0.000000e+00> : vector<1x256xf32>
    %159 = tpu.matmul %157, %2, %cst_19 {dimension_numbers = #tpu.dot_dimension_numbers<[1], [0], [0], [1], [0, 0, 1, 1], [], []>} : vector<1x64xf32>, vector<64x256xf32>, vector<1x256xf32> -> vector<1x256xf32>
    %160 = arith.addf %158, %159 : vector<1x256xf32>
    %161 = arith.mulf %160, %20 : vector<1x256xf32>
    %162 = math.tanh %161 : vector<1x256xf32>
    %163 = arith.mulf %162, %20 : vector<1x256xf32>
    %164 = arith.addf %163, %23 : vector<1x256xf32>
    %165 = vector.extract_strided_slice %164 {offsets = [0, 0], sizes = [1, 64], strides = [1, 1]} : vector<1x256xf32> to vector<1x64xf32>
    %166 = vector.extract_strided_slice %164 {offsets = [0, 64], sizes = [1, 64], strides = [1, 1]} : vector<1x256xf32> to vector<1x64xf32>
    %167 = vector.extract_strided_slice %164 {offsets = [0, 128], sizes = [1, 64], strides = [1, 1]} : vector<1x256xf32> to vector<1x64xf32>
    %168 = vector.extract_strided_slice %164 {offsets = [0, 192], sizes = [1, 64], strides = [1, 1]} : vector<1x256xf32> to vector<1x64xf32>
    %169 = arith.mulf %166, %155 : vector<1x64xf32>
    %170 = arith.mulf %165, %167 : vector<1x64xf32>
    %171 = arith.addf %169, %170 : vector<1x64xf32>
    %172 = math.tanh %171 : vector<1x64xf32>
    %173 = arith.mulf %168, %172 : vector<1x64xf32>
    %174 = vector.extract_strided_slice %173 {offsets = [0, 32], sizes = [1, 32], strides = [1, 1]} : vector<1x64xf32> to vector<1x32xf32>
    %c0_20 = arith.constant 0 : index
    %c0_21 = arith.constant 0 : index
    %175 = vector.load %arg2[%c0_20, %c0_21] : memref<1x32xf32, #tpu.memory_space<vmem>>, vector<1x32xf32>
    tpu.vector_store %arg2[%c0_20, %c0_21], %174 {strides = array<i32>} : memref<1x32xf32, #tpu.memory_space<vmem>>, vector<1x32xf32>,
    return
  }
}

</mosaic_0001>

<bundles_post_ra>
// kernel: node_nn_forward.1
= control target key start
LH: loop header
LB: loop body
LE: loop exit
PB: predicated region body
PF: predicated region fallthrough
CT: control target
= control target key end

     0   :  { %7 = vsyncpa [#allocation3], 0  ;;  %s1483_s0 = inlined_call_operand.vmem [shape: s32[9,1], index: 0, kind: input, shape index: {}]   ;;  %s1484_s1 = inlined_call_operand.hbm [shape: f32[96,256], index: 1, kind: input, shape index: {}]   ;;  %s1485_s2 = inlined_call_operand.hbm [shape: f32[1,32], index: 2, kind: output, shape index: {}]  }
   0x1   :  { %8 = vsyncpa [#allocation4], 0  ;;  %s1175_s9 = smov [#allocation2]  }
   0x2   :  { %s16_s10 = sshll.u32 %s1175_s9, 4  ;;  %s17_s10 = int_to_ptr.vmem [resolvable:$true] %s16_s10 }
   0x3   :  { %s1139_s11 = scalar_lea.vmem %s17_s10, 3072  ;;  %p1144_p1 = scmp.lt.s32.totalorder %s17_s10, %s17_s10 }
   0x4   :  { %p1140_p0 = scmp.ne.s32.totalorder %s17_s10, %s1139_s11  ;;  %p1145_p2 = scmp.lt.s32.totalorder %s1139_s11, %s1139_s11 }
   0x6   :  { %p1146_p3 = por %p1145_p2, %p1144_p1 }
   0x8   :  { %p1147_p4 = pnand %p1146_p3, %p1140_p0 }
   0xa   :  { %1150 = shalt.err (!%p1147_p4)
}
   0xb   :  { %s1176_s12 = smov 256   ;;  %s1177_s13 = smov 16  }
   0xc   :  { %22 = dma.hbm_to_vmem [thread:$0]  %s1484_s1, 3072, %s17_s10, [#allocation3], %s1176_s12, %s1176_s12, %s1177_s13  }
   0xd   :  { %1171 = dma.done.wait [#allocation3], 3072  }
   0xe   :  { %1172 = vsyncadd [#allocation3], 4294964224  ;;  %v1178_v0 = vmov 0   ;;  %v1179_v1 = vmov 0.0   ;;  %v52_v2 = vld [vmem:[%s1483_s0] sm:$0xff]  ;;  %v31_v3 = vld [vmem:[#allocation2 + $0x28] sm:$0xff]  ;;  %v50_v9 = vlaneseq }
   0xf   :  { %1076 = vset.pattern.permute.xlu0 %v1178_v0  ;;  %148 = vmatprep.mubr.f32.mxu0 %v1179_v1  ;;  %v30_v4 = vld [vmem:[#allocation2 + $0x20] sm:$0xff]  ;;  %v29_v5 = vld [vmem:[#allocation2 + $0x18] sm:$0xff]  ;;  %v28_v6 = vld [vmem:[#allocation2 + $0x10] sm:$0xff]  ;;  %vm77_vm0 = vcmask 195584   ;;  %v1180_v22 = vmov 0.5   ;;  %s1181_s1 = smov 64  }
  0x10   :  { %268 = vmatprep.mubr.f32.mxu1 %v1179_v1  ;;  %55 = vperm.xlu0 %1076, %v52_v2   ;;  %v27_v7 = vld [vmem:[#allocation2 + $0x8] sm:$0xff]  ;;  %v26_v8 = vld [vmem:[#allocation2] sm:$0xff]  ;;  %v1207_v10 = vand.u32 127, %v50_v9  ;;  %v68_v13 = vshrl.u32 %v50_v9, 7  ;;  %v1234_v36 = vld [vmem:[#allocation2 + $0xb8] sm:$0xff]  ;;  %vm200_vm4 = vcmask 523264  }
  0x11   :  { %110 = vmatprep.subr.mxu0 %v31_v3  ;;  %v33_v15 = vld [vmem:[#allocation2 + $0x30] ss:$8 sm:$0x3]  ;;  %v1238_v38 = vld [vmem:[#allocation2 + $0xa8] sm:$0xff]  ;;  %220 = vmatprep.subr.mxu1 %v1234_v36  ;;  %v1241_v39 = vld [vmem:[#allocation2 + $0xa0] sm:$0xff]  ;;  %s1183_s20 = smov [#allocation5]  }
  0x12   :  { %111 = vmatpush1.msra.mxu0 %v30_v4  ;;  %v69_v14 = vsub.s32 0, %v68_v13  ;;  %v161_v16 = vadd.s32 128, %v1207_v10  ;;  %v73_v17 = vsub.s32 1, %v68_v13  ;;  %v1236_v37 = vld [vmem:[#allocation2 + $0xb0] sm:$0xff]  ;;  %v1245_v40 = vld [vmem:[#allocation2 + $0x98] sm:$0xff]  ;;  %v1253_v42 = vld [vmem:[#allocation2 + $0x88] sm:$0xff] }
  0x13   :  { %112 = vmatprep.subr.mxu0 %v29_v5  ;;  %221 = vmatpush1.msra.mxu1 %v1236_v37  ;;  %v1249_v41 = vld [vmem:[#allocation2 + $0x90] sm:$0xff]  ;;  %v1257_v43 = vld [vmem:[#allocation2 + $0x80] sm:$0xff]  ;;  %v1261_v44 = vld [vmem:[#allocation2 + $0x78] sm:$0xff]  ;;  %vm189_vm3 = vcmp.lt.s32.totalorder %v1207_v10, 32  ;;  %s1046_s21 = sshll.u32 %s1183_s20, 4  ;;  %vm1038_vm6 = vcmask 253952   ;;  %s1047_s21 = int_to_ptr.vmem [resolvable:$true] %s1046_s21 }
  0x14   :  { %113 = vmatpush1.msra.mxu0 %v28_v6  ;;  %v1214_v18 = vrot.slane %v33_v15, %v69_v14  ;;  %vm165_vm2 = vcmp.lt.s32.totalorder %v161_v16, 192  ;;  %v1216_v19 = vrot.slane %v33_v15, %v73_v17  ;;  %222 = vmatprep.subr.mxu1 %v1238_v38  ;;  %v1265_v45 = vld [vmem:[#allocation2 + $0x70] sm:$0xff]  ;;  %v1269_v46 = vld [vmem:[#allocation2 + $0x68] sm:$0xff]  ;;  %v1273_v47 = vld [vmem:[#allocation2 + $0x60] sm:$0xff]  ;;  %s1151_s22 = scalar_lea.vmem %s1047_s21, 16  ;;  %s1155_s23 = scalar_lea.vmem %s1047_s21, 32 }
  0x15   :  { %114 = vmatprep.subr.mxu0 %v27_v7  ;;  %v1221_v23 = vsel %vm165_vm2, 1.0, %v1180_v22  ;;  %v1229_v31 = vsel %vm165_vm2, 0.0, %v1180_v22  ;;  %223 = vmatpush1.msra.mxu1 %v1241_v39  ;;  %v1277_v48 = vld [vmem:[#allocation2 + $0x58] sm:$0xff]  ;;  %v1281_v49 = vld [vmem:[#allocation2 + $0x50] sm:$0xff]  ;;  %v1285_v50 = vld [vmem:[#allocation2 + $0x48] sm:$0xff]  ;;  %p1152_p5 = scmp.ne.s32.totalorder %s1047_s21, %s1151_s22  ;;  %p1156_p6 = scmp.lt.s32.totalorder %s1047_s21, %s1047_s21 }
  0x16   :  { %115 = vmatpush1.msra.mxu0 %v26_v8  ;;  %224 = vmatprep.subr.mxu1 %v1245_v40  ;;  %v1294_v54 = vld [vmem:[#allocation2 + $0x40] sm:$0xff]  ;;  %v53_v62 = vld [vmem:[%s1483_s0 + $0x8] sm:$0x1]  ;;  %s1182_s0 = smov 32   ;;  %p1157_p7 = scmp.lt.s32.totalorder %s1155_s23, %s1151_s22 }
  0x17   :  { %327 = vmatprep.subr.mxu0 %v1234_v36  ;;  %225 = vmatpush1.msra.mxu1 %v1249_v41 }
  0x18   :  { %226 = vmatprep.subr.mxu1 %v1253_v42  ;;  %p1158_p8 = por %p1157_p7, %p1156_p6 }
  0x19   :  { %227 = vmatpush1.msra.mxu1 %v1257_v43 }
  0x1a   :  { %228 = vmatprep.subr.mxu1 %v1261_v44  ;;  %p1159_p9 = pnand %p1158_p8, %p1152_p5 }
  0x1b   :  { %229 = vmatpush1.msra.mxu1 %v1265_v45 }
  0x1c   :  { %230 = vmatprep.subr.mxu1 %v1269_v46 }
  0x1d   :  { %231 = vmatpush1.msra.mxu1 %v1273_v47 }
  0x1e   :  { %232 = vmatprep.subr.mxu1 %v1277_v48 }
  0x1f   :  { %233 = vmatpush1.msra.mxu1 %v1281_v49 }
  0x20   :  { %234 = vmatprep.subr.mxu1 %v1285_v50 }
  0x21   :  { %235 = vmatpush1.msra.mxu1 %v1294_v54 }
  0x22   :  { %432 = vmatprep.subr.mxu1 %v1234_v36 }
  0x8b   :  { %v56_v11 = vpop.permute.xlu0 %55 }
  0x8c   :  { %vm60_vm1 = vcmp.eq.s32.totalorder %v56_v11, %v1207_v10 }
  0x8d   :  { %v1055_v12 = vsel %vm60_vm1, 1.0, %v1179_v1 }
  0x8e   :  { %1057 = vmatmul.mubr.msk.f32.vlgmr.msra.gmra.mxu0 %vm77_vm0, %v1055_v12 }
  0x8f   :  { %154 = vmatprep.mubr.f32.mxu0 %v1179_v1  ;;  %328 = vmatpush1.msra.mxu0 %v1236_v37 }
  0x90   :  { %329 = vmatprep.subr.mxu0 %v1238_v38 }
  0x91   :  { %330 = vmatpush1.msra.mxu0 %v1241_v39 }
  0x92   :  { %331 = vmatprep.subr.mxu0 %v1245_v40 }
  0x93   :  { %332 = vmatpush1.msra.mxu0 %v1249_v41 }
  0x94   :  { %333 = vmatprep.subr.mxu0 %v1253_v42 }
  0x95   :  { %334 = vmatpush1.msra.mxu0 %v1257_v43 }
  0x96   :  { %335 = vmatprep.subr.mxu0 %v1261_v44 }
  0x97   :  { %336 = vmatpush1.msra.mxu0 %v1265_v45 }
  0x98   :  { %337 = vmatprep.subr.mxu0 %v1269_v46 }
  0x99   :  { %338 = vmatpush1.msra.mxu0 %v1273_v47 }
  0x9a   :  { %339 = vmatprep.subr.mxu0 %v1277_v48 }
  0x9b   :  { %340 = vmatpush1.msra.mxu0 %v1281_v49 }
  0x9c   :  { %341 = vmatprep.subr.mxu0 %v1285_v50 }
  0x9d   :  { %342 = vmatpush1.msra.mxu0 %v1294_v54 }
  0x9e   :  { %537 = vmatprep.subr.mxu0 %v1234_v36 }
 0x14e   :  { %v150_v20 = vpop.f32.mrf.mxu0 }
 0x14f   :  { %v1219_v21 = vadd.f32 %v150_v20, %v1214_v18 }
 0x150   :  { %v152_v24 = vpop.f32.mrf.mxu0 }
 0x151   :  { %v1224_v25 = vadd.f32 %v152_v24, %v1216_v19  ;;  %v172_v26 = vmul.f32 0.5, %v1219_v21 }
 0x153   :  { %v173_v27 = vmul.f32 %v1221_v23, %v1224_v25  ;;  %1077 = vtanh.f32 %v172_v26 }
 0x155   :  { %1079 = vtanh.f32 %v173_v27 }
 0x160   :  { %v1078_v28 = vpop.eup %1077 }
 0x161   :  { %v176_v29 = vmul.f32 0.5, %v1078_v28 }
 0x162   :  { %v1080_v30 = vpop.eup %1079 }
 0x163   :  { %v177_v32 = vmul.f32 %v1080_v30, %v1221_v23  ;;  %v178_v33 = vadd.f32 0.5, %v176_v29 }
 0x165   :  { %v179_v34 = vadd.f32 %v177_v32, %v1229_v31  ;;  %v180_v51 = vmul.f32 0.0, %v178_v33 }
 0x167   :  { %v181_v35 = vmul.f32 %v179_v34, %v178_v33 }
 0x169   :  { %183 = vrot.lane.b32.xlu0 %v181_v35, %s1181_s1 }
 0x1db   :  { %v184_v52 = vpop.permute.xlu0 %183 }
 0x1dc   :  { %v186_v53 = vadd.f32 %v184_v52, %v180_v51 }
 0x1de   :  { %1081 = vtanh.f32 %v186_v53 }
 0x1eb   :  { %v1082_v55 = vpop.eup %1081 }
 0x1ec   :  { %v188_v56 = vmul.f32 %v1082_v55, %v179_v34 }
 0x1ee   :  { %191 = vrot.lane.b32.xlu1 %v188_v56, %s1181_s1 }
 0x1f2   :  { %196 = vrot.lane.b32.xlu1 %v186_v53, %s1181_s1 }
 0x260   :  { %v192_v57 = vpop.permute.xlu1 %191 }
 0x261   :  { %v194_v58 = vsel %vm189_vm3, %v192_v57, 0.0 }
 0x262   :  { %1059 = vmatmul.mubr.msk.f32.vlgmr.msra.gmra.mxu1 %vm200_vm4, %v194_v58 }
 0x263   :  { %433 = vmatpush1.msra.mxu1 %v1236_v37  ;;  %480 = vmatprep.mubr.f32.mxu1 %v1179_v1 }
 0x264   :  { %v197_v59 = vpop.permute.xlu1 %196  ;;  %434 = vmatprep.subr.mxu1 %v1238_v38 }
 0x265   :  { %v199_v60 = vsel %vm189_vm3, %v197_v59, 0.0  ;;  %435 = vmatpush1.msra.mxu1 %v1241_v39 }
 0x266   :  { %v292_v61 = vrot.slane %v199_v60, 7  ;;  %436 = vmatprep.subr.mxu1 %v1245_v40 }
 0x267   :  { %437 = vmatpush1.msra.mxu1 %v1249_v41 }
 0x268   :  { %293 = vrot.lane.b32.xlu0 %v292_v61, %s1181_s1  ;;  %438 = vmatprep.subr.mxu1 %v1253_v42 }
 0x269   :  { %439 = vmatpush1.msra.mxu1 %v1257_v43 }
 0x26a   :  { %440 = vmatprep.subr.mxu1 %v1261_v44 }
 0x26b   :  { %441 = vmatpush1.msra.mxu1 %v1265_v45 }
 0x26c   :  { %58 = vperm.xlu0 %1076, %v53_v62   ;;  %442 = vmatprep.subr.mxu1 %v1269_v46 }
 0x26d   :  { %443 = vmatpush1.msra.mxu1 %v1273_v47 }
 0x26e   :  { %444 = vmatprep.subr.mxu1 %v1277_v48 }
 0x26f   :  { %445 = vmatpush1.msra.mxu1 %v1281_v49 }
 0x270   :  { %446 = vmatprep.subr.mxu1 %v1285_v50 }
 0x271   :  { %447 = vmatpush1.msra.mxu1 %v1294_v54 }
 0x272   :  { %642 = vmatprep.subr.mxu1 %v1234_v36 }
 0x2da   :  { %v294_v63 = vpop.permute.xlu0 %293 }
 0x2e7   :  { %v59_v0 = vpop.permute.xlu0 %58 }
 0x2e8   :  { %vm61_vm5 = vcmp.eq.s32.totalorder %v59_v0, %v1207_v10 }
 0x2e9   :  { %v1056_v2 = vsel %vm61_vm5, 1.0, %v1179_v1 }
 0x2ea   :  { %1058 = vmatmul.mubr.msk.f32.gmra.mxu0 %vm77_vm0, %v1056_v2 }
 0x2eb   :  { %375 = vmatprep.mubr.f32.mxu0 %v1179_v1 }
 0x322   :  { %v270_v3 = vpop.f32.mrf.mxu1 }
 0x323   :  { %v277_v4 = vrot.slane %v270_v3, 7 }
 0x324   :  { %v272_v5 = vpop.f32.mrf.mxu1 }
 0x325   :  { %v281_v6 = vadd.f32 %v277_v4, %v1219_v21  ;;  %v278_v7 = vrot.slane %v272_v5, 7 }
 0x327   :  { %v283_v8 = vmul.f32 0.5, %v281_v6  ;;  %v282_v9 = vadd.f32 %v278_v7, %v1224_v25 }
 0x329   :  { %1083 = vtanh.f32 %v283_v8  ;;  %v284_v11 = vmul.f32 %v282_v9, %v1221_v23 }
 0x32b   :  { %1085 = vtanh.f32 %v284_v11 }
 0x336   :  { %v1084_v10 = vpop.eup %1083 }
 0x337   :  { %v287_v12 = vmul.f32 0.5, %v1084_v10 }
 0x338   :  { %v1086_v13 = vpop.eup %1085 }
 0x339   :  { %v288_v14 = vmul.f32 %v1086_v13, %v1221_v23  ;;  %v289_v15 = vadd.f32 0.5, %v287_v12 }
 0x33b   :  { %v290_v16 = vadd.f32 %v288_v14, %v1229_v31  ;;  %v296_v20 = vmul.f32 %v294_v63, %v289_v15 }
 0x33d   :  { %v297_v17 = vmul.f32 %v290_v16, %v289_v15 }
 0x33f   :  { %299 = vrot.lane.b32.xlu1 %v297_v17, %s1181_s1 }
 0x3aa   :  { %v1354_v30 = vpop.f32.mrf.mxu0 }
 0x3ac   :  { %v1356_v32 = vpop.f32.mrf.mxu0 }
 0x3b1   :  { %v300_v22 = vpop.permute.xlu1 %299 }
 0x3b2   :  { %v302_v24 = vadd.f32 %v300_v22, %v296_v20 }
 0x3b4   :  { %1087 = vtanh.f32 %v302_v24  ;;  %v399_v60 = vrot.slane %v302_v24, 7 }
 0x3c1   :  { %v1088_v26 = vpop.eup %1087 }
 0x3c2   :  { %v304_v27 = vmul.f32 %v1088_v26, %v290_v16 }
 0x3c4   :  { %v306_v28 = vrot.slane %v304_v27, 1 }
 0x3c6   :  { %307 = vrot.lane.b32.xlu1 %v306_v28, %s1181_s1 }
 0x438   :  { %v308_v29 = vpop.permute.xlu1 %307 }
 0x439   :  { %1060 = vmatmul.mubr.msk.f32.vlgmr.msra.gmra.mxu0 %vm200_vm4, %v308_v29 }
 0x43a   :  { %538 = vmatpush1.msra.mxu0 %v1236_v37  ;;  %585 = vmatprep.mubr.f32.mxu0 %v1179_v1 }
 0x43b   :  { %539 = vmatprep.subr.mxu0 %v1238_v38 }
 0x43c   :  { %540 = vmatpush1.msra.mxu0 %v1241_v39 }
 0x43d   :  { %541 = vmatprep.subr.mxu0 %v1245_v40 }
 0x43e   :  { %542 = vmatpush1.msra.mxu0 %v1249_v41 }
 0x43f   :  { %543 = vmatprep.subr.mxu0 %v1253_v42 }
 0x440   :  { %544 = vmatpush1.msra.mxu0 %v1257_v43 }
 0x441   :  { %545 = vmatprep.subr.mxu0 %v1261_v44 }
 0x442   :  { %546 = vmatpush1.msra.mxu0 %v1265_v45 }
 0x443   :  { %547 = vmatprep.subr.mxu0 %v1269_v46 }
 0x444   :  { %548 = vmatpush1.msra.mxu0 %v1273_v47 }
 0x445   :  { %549 = vmatprep.subr.mxu0 %v1277_v48 }
 0x446   :  { %550 = vmatpush1.msra.mxu0 %v1281_v49 }
 0x447   :  { %551 = vmatprep.subr.mxu0 %v1285_v50 }
 0x448   :  { %552 = vmatpush1.msra.mxu0 %v1294_v54 }
 0x449   :  { %747 = vmatprep.subr.mxu0 %v1234_v36 }
 0x4f9   :  { %v377_v33 = vpop.f32.mrf.mxu0 }
 0x4fa   :  { %v384_v34 = vrot.slane %v377_v33, 6 }
 0x4fb   :  { %v379_v35 = vpop.f32.mrf.mxu0 }
 0x4fc   :  { %v388_v51 = vadd.f32 %v384_v34, %v1219_v21  ;;  %v385_v52 = vrot.slane %v379_v35, 6 }
 0x4fe   :  { %v390_v53 = vmul.f32 0.5, %v388_v51  ;;  %v389_v55 = vadd.f32 %v385_v52, %v1224_v25 }
 0x500   :  { %1089 = vtanh.f32 %v390_v53  ;;  %v391_v56 = vmul.f32 %v389_v55, %v1221_v23 }
 0x502   :  { %1091 = vtanh.f32 %v391_v56 }
 0x50d   :  { %v1090_v57 = vpop.eup %1089 }
 0x50e   :  { %v394_v58 = vmul.f32 0.5, %v1090_v57 }
 0x50f   :  { %v1092_v59 = vpop.eup %1091 }
 0x510   :  { %v395_v61 = vmul.f32 %v1092_v59, %v1221_v23  ;;  %v396_v62 = vadd.f32 0.5, %v394_v58 }
 0x512   :  { %v397_v63 = vadd.f32 %v395_v61, %v1229_v31  ;;  %v401_v0 = vmul.f32 %v399_v60, %v396_v62 }
 0x514   :  { %v402_v2 = vmul.f32 %v397_v63, %v396_v62 }
 0x516   :  { %404 = vrot.lane.b32.xlu0 %v402_v2, %s1181_s1 }
 0x588   :  { %v405_v3 = vpop.permute.xlu0 %404 }
 0x589   :  { %v407_v4 = vadd.f32 %v405_v3, %v401_v0 }
 0x58b   :  { %1093 = vtanh.f32 %v407_v4  ;;  %v504_v24 = vrot.slane %v407_v4, 7 }
 0x598   :  { %v1094_v5 = vpop.eup %1093 }
 0x599   :  { %v409_v6 = vmul.f32 %v1094_v5, %v397_v63 }
 0x59b   :  { %v411_v7 = vrot.slane %v409_v6, 2 }
 0x59d   :  { %412 = vrot.lane.b32.xlu1 %v411_v7, %s1181_s1 }
 0x60f   :  { %v413_v8 = vpop.permute.xlu1 %412 }
 0x610   :  { %1061 = vmatmul.mubr.msk.f32.vlgmr.msra.gmra.mxu1 %vm200_vm4, %v413_v8 }
 0x611   :  { %643 = vmatpush1.msra.mxu1 %v1236_v37  ;;  %690 = vmatprep.mubr.f32.mxu1 %v1179_v1 }
 0x612   :  { %644 = vmatprep.subr.mxu1 %v1238_v38 }
 0x613   :  { %645 = vmatpush1.msra.mxu1 %v1241_v39 }
 0x614   :  { %646 = vmatprep.subr.mxu1 %v1245_v40 }
 0x615   :  { %647 = vmatpush1.msra.mxu1 %v1249_v41 }
 0x616   :  { %648 = vmatprep.subr.mxu1 %v1253_v42 }
 0x617   :  { %649 = vmatpush1.msra.mxu1 %v1257_v43 }
 0x618   :  { %650 = vmatprep.subr.mxu1 %v1261_v44 }
 0x619   :  { %651 = vmatpush1.msra.mxu1 %v1265_v45 }
 0x61a   :  { %652 = vmatprep.subr.mxu1 %v1269_v46 }
 0x61b   :  { %653 = vmatpush1.msra.mxu1 %v1273_v47 }
 0x61c   :  { %654 = vmatprep.subr.mxu1 %v1277_v48 }
 0x61d   :  { %655 = vmatpush1.msra.mxu1 %v1281_v49 }
 0x61e   :  { %656 = vmatprep.subr.mxu1 %v1285_v50 }
 0x61f   :  { %657 = vmatpush1.msra.mxu1 %v1294_v54 }
 0x620   :  { %852 = vmatprep.subr.mxu1 %v1234_v36 }
 0x6d0   :  { %v482_v9 = vpop.f32.mrf.mxu1 }
 0x6d1   :  { %v489_v11 = vrot.slane %v482_v9, 5 }
 0x6d2   :  { %v484_v10 = vpop.f32.mrf.mxu1 }
 0x6d3   :  { %v493_v12 = vadd.f32 %v489_v11, %v1219_v21  ;;  %v490_v13 = vrot.slane %v484_v10, 5 }
 0x6d5   :  { %v495_v14 = vmul.f32 0.5, %v493_v12  ;;  %v494_v15 = vadd.f32 %v490_v13, %v1224_v25 }
 0x6d7   :  { %1095 = vtanh.f32 %v495_v14  ;;  %v496_v16 = vmul.f32 %v494_v15, %v1221_v23 }
 0x6d9   :  { %1097 = vtanh.f32 %v496_v16 }
 0x6e4   :  { %v1096_v17 = vpop.eup %1095 }
 0x6e5   :  { %v499_v20 = vmul.f32 0.5, %v1096_v17 }
 0x6e6   :  { %v1098_v22 = vpop.eup %1097 }
 0x6e7   :  { %v500_v26 = vmul.f32 %v1098_v22, %v1221_v23  ;;  %v501_v27 = vadd.f32 0.5, %v499_v20 }
 0x6e9   :  { %v502_v28 = vadd.f32 %v500_v26, %v1229_v31  ;;  %v506_v29 = vmul.f32 %v504_v24, %v501_v27 }
 0x6eb   :  { %v507_v33 = vmul.f32 %v502_v28, %v501_v27 }
 0x6ed   :  { %509 = vrot.lane.b32.xlu0 %v507_v33, %s1181_s1 }
 0x75f   :  { %v510_v34 = vpop.permute.xlu0 %509 }
 0x760   :  { %v512_v35 = vadd.f32 %v510_v34, %v506_v29 }
 0x762   :  { %1099 = vtanh.f32 %v512_v35  ;;  %v609_v4 = vrot.slane %v512_v35, 7 }
 0x76f   :  { %v1100_v51 = vpop.eup %1099 }
 0x770   :  { %v514_v52 = vmul.f32 %v1100_v51, %v502_v28 }
 0x772   :  { %v516_v53 = vrot.slane %v514_v52, 3 }
 0x774   :  { %517 = vrot.lane.b32.xlu1 %v516_v53, %s1181_s1 }
 0x7e6   :  { %v518_v55 = vpop.permute.xlu1 %517 }
 0x7e7   :  { %1062 = vmatmul.mubr.msk.f32.vlgmr.msra.gmra.mxu0 %vm200_vm4, %v518_v55 }
 0x7e8   :  { %748 = vmatpush1.msra.mxu0 %v1236_v37  ;;  %795 = vmatprep.mubr.f32.mxu0 %v1179_v1 }
 0x7e9   :  { %749 = vmatprep.subr.mxu0 %v1238_v38 }
 0x7ea   :  { %750 = vmatpush1.msra.mxu0 %v1241_v39 }
 0x7eb   :  { %751 = vmatprep.subr.mxu0 %v1245_v40 }
 0x7ec   :  { %752 = vmatpush1.msra.mxu0 %v1249_v41 }
 0x7ed   :  { %753 = vmatprep.subr.mxu0 %v1253_v42 }
 0x7ee   :  { %754 = vmatpush1.msra.mxu0 %v1257_v43 }
 0x7ef   :  { %755 = vmatprep.subr.mxu0 %v1261_v44 }
 0x7f0   :  { %756 = vmatpush1.msra.mxu0 %v1265_v45 }
 0x7f1   :  { %757 = vmatprep.subr.mxu0 %v1269_v46 }
 0x7f2   :  { %758 = vmatpush1.msra.mxu0 %v1273_v47 }
 0x7f3   :  { %759 = vmatprep.subr.mxu0 %v1277_v48 }
 0x7f4   :  { %760 = vmatpush1.msra.mxu0 %v1281_v49 }
 0x7f5   :  { %761 = vmatprep.subr.mxu0 %v1285_v50 }
 0x7f6   :  { %762 = vmatpush1.msra.mxu0 %v1294_v54 }
 0x7f7   :  { %957 = vmatprep.subr.mxu0 %v1234_v36 }
 0x8a7   :  { %v587_v56 = vpop.f32.mrf.mxu0 }
 0x8a8   :  { %v594_v57 = vrot.slane %v587_v56, 4 }
 0x8a9   :  { %v589_v58 = vpop.f32.mrf.mxu0 }
 0x8aa   :  { %v598_v59 = vadd.f32 %v594_v57, %v1219_v21  ;;  %v595_v60 = vrot.slane %v589_v58, 4 }
 0x8ac   :  { %v600_v61 = vmul.f32 0.5, %v598_v59  ;;  %v599_v62 = vadd.f32 %v595_v60, %v1224_v25 }
 0x8ae   :  { %1101 = vtanh.f32 %v600_v61  ;;  %v601_v63 = vmul.f32 %v599_v62, %v1221_v23 }
 0x8b0   :  { %1103 = vtanh.f32 %v601_v63 }
 0x8bb   :  { %v1102_v0 = vpop.eup %1101 }
 0x8bc   :  { %v604_v2 = vmul.f32 0.5, %v1102_v0 }
 0x8bd   :  { %v1104_v3 = vpop.eup %1103 }
 0x8be   :  { %v605_v5 = vmul.f32 %v1104_v3, %v1221_v23  ;;  %v606_v36 = vadd.f32 0.5, %v604_v2 }
 0x8c0   :  { %v607_v6 = vadd.f32 %v605_v5, %v1229_v31  ;;  %v611_v7 = vmul.f32 %v609_v4, %v606_v36 }
 0x8c2   :  { %v612_v8 = vmul.f32 %v607_v6, %v606_v36 }
 0x8c4   :  { %614 = vrot.lane.b32.xlu0 %v612_v8, %s1181_s1 }
 0x936   :  { %v615_v9 = vpop.permute.xlu0 %614 }
 0x937   :  { %v617_v11 = vadd.f32 %v615_v9, %v611_v7 }
 0x939   :  { %1105 = vtanh.f32 %v617_v11  ;;  %v714_v34 = vrot.slane %v617_v11, 7 }
 0x946   :  { %v1106_v10 = vpop.eup %1105 }
 0x947   :  { %v619_v12 = vmul.f32 %v1106_v10, %v607_v6 }
 0x949   :  { %v621_v13 = vrot.slane %v619_v12, 4 }
 0x94b   :  { %622 = vrot.lane.b32.xlu1 %v621_v13, %s1181_s1 }
 0x9bd   :  { %v623_v14 = vpop.permute.xlu1 %622 }
 0x9be   :  { %1063 = vmatmul.mubr.msk.f32.vlgmr.msra.gmra.mxu1 %vm200_vm4, %v623_v14 }
 0x9bf   :  { %853 = vmatpush1.msra.mxu1 %v1236_v37  ;;  %900 = vmatprep.mubr.f32.mxu1 %v1179_v1 }
 0x9c0   :  { %854 = vmatprep.subr.mxu1 %v1238_v38 }
 0x9c1   :  { %855 = vmatpush1.msra.mxu1 %v1241_v39 }
 0x9c2   :  { %856 = vmatprep.subr.mxu1 %v1245_v40 }
 0x9c3   :  { %857 = vmatpush1.msra.mxu1 %v1249_v41 }
 0x9c4   :  { %858 = vmatprep.subr.mxu1 %v1253_v42 }
 0x9c5   :  { %859 = vmatpush1.msra.mxu1 %v1257_v43 }
 0x9c6   :  { %860 = vmatprep.subr.mxu1 %v1261_v44 }
 0x9c7   :  { %861 = vmatpush1.msra.mxu1 %v1265_v45 }
 0x9c8   :  { %862 = vmatprep.subr.mxu1 %v1269_v46 }
 0x9c9   :  { %863 = vmatpush1.msra.mxu1 %v1273_v47 }
 0x9ca   :  { %864 = vmatprep.subr.mxu1 %v1277_v48 }
 0x9cb   :  { %865 = vmatpush1.msra.mxu1 %v1281_v49 }
 0x9cc   :  { %866 = vmatprep.subr.mxu1 %v1285_v50 }
 0x9cd   :  { %867 = vmatpush1.msra.mxu1 %v1294_v54 }
 0xa7e   :  { %v692_v15 = vpop.f32.mrf.mxu1 }
 0xa7f   :  { %v699_v16 = vrot.slane %v692_v15, 3 }
 0xa80   :  { %v694_v17 = vpop.f32.mrf.mxu1 }
 0xa81   :  { %v703_v20 = vadd.f32 %v699_v16, %v1219_v21  ;;  %v700_v22 = vrot.slane %v694_v17, 3 }
 0xa83   :  { %v705_v24 = vmul.f32 0.5, %v703_v20  ;;  %v704_v26 = vadd.f32 %v700_v22, %v1224_v25 }
 0xa85   :  { %1107 = vtanh.f32 %v705_v24  ;;  %v706_v27 = vmul.f32 %v704_v26, %v1221_v23 }
 0xa87   :  { %1109 = vtanh.f32 %v706_v27 }
 0xa92   :  { %v1108_v28 = vpop.eup %1107 }
 0xa93   :  { %v709_v29 = vmul.f32 0.5, %v1108_v28 }
 0xa94   :  { %v1110_v33 = vpop.eup %1109 }
 0xa95   :  { %v710_v35 = vmul.f32 %v1110_v33, %v1221_v23  ;;  %v711_v51 = vadd.f32 0.5, %v709_v29 }
 0xa97   :  { %v712_v52 = vadd.f32 %v710_v35, %v1229_v31  ;;  %v716_v53 = vmul.f32 %v714_v34, %v711_v51  ;;  %v157_v34 = vadd.f32 %v1354_v30, %v1214_v18 }
 0xa99   :  { %v717_v55 = vmul.f32 %v712_v52, %v711_v51  ;;  %v159_v51 = vadd.f32 %v1356_v32, %v1216_v19 }
 0xa9b   :  { %719 = vrot.lane.b32.xlu0 %v717_v55, %s1181_s1 }
 0xb0d   :  { %v720_v56 = vpop.permute.xlu0 %719 }
 0xb0e   :  { %v722_v57 = vadd.f32 %v720_v56, %v716_v53 }
 0xb10   :  { %1111 = vtanh.f32 %v722_v57 }
 0xb1d   :  { %v1112_v58 = vpop.eup %1111 }
 0xb1e   :  { %v724_v59 = vmul.f32 %v1112_v58, %v712_v52 }
 0xb20   :  { %v726_v60 = vrot.slane %v724_v59, 5 }
 0xb22   :  { %727 = vrot.lane.b32.xlu1 %v726_v60, %s1181_s1 }
 0xb94   :  { %v728_v61 = vpop.permute.xlu1 %727 }
 0xb95   :  { %1064 = vmatmul.mubr.msk.f32.vlgmr.msra.gmra.mxu0 %vm200_vm4, %v728_v61 }
 0xb96   :  { %958 = vmatpush1.msra.mxu0 %v1236_v37  ;;  %1005 = vmatprep.mubr.f32.mxu0 %v1179_v1 }
 0xb97   :  { %959 = vmatprep.subr.mxu0 %v1238_v38 }
 0xb98   :  { %960 = vmatpush1.msra.mxu0 %v1241_v39 }
 0xb99   :  { %961 = vmatprep.subr.mxu0 %v1245_v40 }
 0xb9a   :  { %962 = vmatpush1.msra.mxu0 %v1249_v41 }
 0xb9b   :  { %963 = vmatprep.subr.mxu0 %v1253_v42 }
 0xb9c   :  { %964 = vmatpush1.msra.mxu0 %v1257_v43 }
 0xb9d   :  { %965 = vmatprep.subr.mxu0 %v1261_v44 }
 0xb9e   :  { %966 = vmatpush1.msra.mxu0 %v1265_v45 }
 0xb9f   :  { %967 = vmatprep.subr.mxu0 %v1269_v46 }
 0xba0   :  { %968 = vmatpush1.msra.mxu0 %v1273_v47  ;;  %v819_v47 = vrot.slane %v722_v57, 7 }
 0xba1   :  { %969 = vmatprep.subr.mxu0 %v1277_v48 }
 0xba2   :  { %970 = vmatpush1.msra.mxu0 %v1281_v49 }
 0xba3   :  { %971 = vmatprep.subr.mxu0 %v1285_v50 }
 0xba4   :  { %972 = vmatpush1.msra.mxu0 %v1294_v54 }
 0xc55   :  { %v797_v1 = vpop.f32.mrf.mxu0 }
 0xc56   :  { %v804_v37 = vrot.slane %v797_v1, 2 }
 0xc57   :  { %v799_v38 = vpop.f32.mrf.mxu0 }
 0xc58   :  { %v808_v39 = vadd.f32 %v804_v37, %v1219_v21  ;;  %v805_v40 = vrot.slane %v799_v38, 2 }
 0xc5a   :  { %v810_v41 = vmul.f32 0.5, %v808_v39  ;;  %v809_v42 = vadd.f32 %v805_v40, %v1224_v25 }
 0xc5c   :  { %1113 = vtanh.f32 %v810_v41  ;;  %v811_v43 = vmul.f32 %v809_v42, %v1221_v23 }
 0xc5e   :  { %1115 = vtanh.f32 %v811_v43 }
 0xc69   :  { %v1114_v44 = vpop.eup %1113 }
 0xc6a   :  { %v814_v45 = vmul.f32 0.5, %v1114_v44 }
 0xc6b   :  { %v1116_v46 = vpop.eup %1115 }
 0xc6c   :  { %v815_v48 = vmul.f32 %v1116_v46, %v1221_v23  ;;  %v816_v49 = vadd.f32 0.5, %v814_v45 }
 0xc6e   :  { %v817_v50 = vadd.f32 %v815_v48, %v1229_v31  ;;  %v821_v54 = vmul.f32 %v819_v47, %v816_v49 }
 0xc70   :  { %v822_v62 = vmul.f32 %v817_v50, %v816_v49 }
 0xc72   :  { %824 = vrot.lane.b32.xlu0 %v822_v62, %s1181_s1 }
 0xce4   :  { %v825_v63 = vpop.permute.xlu0 %824 }
 0xce5   :  { %v827_v0 = vadd.f32 %v825_v63, %v821_v54 }
 0xce7   :  { %1117 = vtanh.f32 %v827_v0  ;;  %v924_v16 = vrot.slane %v827_v0, 7 }
 0xcf4   :  { %v1118_v2 = vpop.eup %1117 }
 0xcf5   :  { %v829_v3 = vmul.f32 %v1118_v2, %v817_v50 }
 0xcf7   :  { %v831_v4 = vrot.slane %v829_v3, 6 }
 0xcf9   :  { %832 = vrot.lane.b32.xlu1 %v831_v4, %s1181_s1 }
 0xd6b   :  { %v833_v5 = vpop.permute.xlu1 %832 }
 0xd6c   :  { %1065 = vmatmul.mubr.msk.f32.vlgmr.msra.gmra.mxu1 %vm200_vm4, %v833_v5 }
 0xe2c   :  { %v902_v36 = vpop.f32.mrf.mxu1 }
 0xe2d   :  { %v909_v6 = vrot.slane %v902_v36, 1 }
 0xe2e   :  { %v904_v7 = vpop.f32.mrf.mxu1 }
 0xe2f   :  { %v913_v8 = vadd.f32 %v909_v6, %v1219_v21  ;;  %v910_v9 = vrot.slane %v904_v7, 1 }
 0xe31   :  { %v915_v11 = vmul.f32 0.5, %v913_v8  ;;  %v914_v10 = vadd.f32 %v910_v9, %v1224_v25 }
 0xe33   :  { %1119 = vtanh.f32 %v915_v11  ;;  %v916_v12 = vmul.f32 %v914_v10, %v1221_v23 }
 0xe35   :  { %1121 = vtanh.f32 %v916_v12 }
 0xe40   :  { %v1120_v13 = vpop.eup %1119 }
 0xe41   :  { %v919_v14 = vmul.f32 0.5, %v1120_v13 }
 0xe42   :  { %v1122_v15 = vpop.eup %1121 }
 0xe43   :  { %v920_v17 = vmul.f32 %v1122_v15, %v1221_v23  ;;  %v921_v20 = vadd.f32 0.5, %v919_v14 }
 0xe45   :  { %v922_v22 = vadd.f32 %v920_v17, %v1229_v31  ;;  %v926_v24 = vmul.f32 %v924_v16, %v921_v20 }
 0xe47   :  { %v927_v26 = vmul.f32 %v922_v22, %v921_v20 }
 0xe49   :  { %929 = vrot.lane.b32.xlu0 %v927_v26, %s1181_s1 }
 0xebb   :  { %v930_v21 = vpop.permute.xlu0 %929 }
 0xebc   :  { %v932_v27 = vadd.f32 %v930_v21, %v926_v24 }
 0xebe   :  { %1123 = vtanh.f32 %v932_v27  ;;  %v1023_v61 = vrot.slane %v932_v27, 7 }
 0xecb   :  { %v1124_v25 = vpop.eup %1123 }
 0xecc   :  { %v934_v28 = vmul.f32 %v1124_v25, %v922_v22 }
 0xece   :  { %v936_v29 = vrot.slane %v934_v28, 7 }
 0xed0   :  { %937 = vrot.lane.b32.xlu1 %v936_v29, %s1181_s1 }
 0xf42   :  { %v938_v33 = vpop.permute.xlu1 %937 }
 0xf43   :  { %1066 = vmatmul.mubr.msk.f32.vlgmr.msra.gmra.mxu0 %vm200_vm4, %v938_v33 }
0x1003   :  { %v1007_v35 = vpop.f32.mrf.mxu0 }
0x1004   :  { %v1012_v52 = vadd.f32 %v1007_v35, %v157_v34 }
0x1005   :  { %v1009_v53 = vpop.f32.mrf.mxu0 }
0x1006   :  { %v1014_v55 = vmul.f32 0.5, %v1012_v52  ;;  %v1013_v56 = vadd.f32 %v1009_v53, %v159_v51 }
0x1008   :  { %1125 = vtanh.f32 %v1014_v55  ;;  %v1015_v57 = vmul.f32 %v1013_v56, %v1221_v23 }
0x100a   :  { %1127 = vtanh.f32 %v1015_v57 }
0x1015   :  { %v1126_v58 = vpop.eup %1125 }
0x1016   :  { %v1018_v59 = vmul.f32 0.5, %v1126_v58 }
0x1017   :  { %v1128_v60 = vpop.eup %1127 }
0x1018   :  { %v1020_v1 = vadd.f32 0.5, %v1018_v59  ;;  %v1019_v37 = vmul.f32 %v1128_v60, %v1221_v23 }
0x101a   :  { %v1021_v18 = vadd.f32 %v1019_v37, %v1229_v31  ;;  %v1025_v30 = vmul.f32 %v1023_v61, %v1020_v1 }
0x101c   :  { %v1026_v38 = vmul.f32 %v1021_v18, %v1020_v1 }
0x101e   :  { %1028 = vrot.lane.b32.xlu0 %v1026_v38, %s1181_s1 }
0x1090   :  { %v1029_v19 = vpop.permute.xlu0 %1028 }
0x1091   :  { %v1031_v32 = vadd.f32 %v1029_v19, %v1025_v30 }
0x1093   :  { %1129 = vtanh.f32 %v1031_v32 }
0x10a0   :  { %v1130_v39 = vpop.eup %1129 }
0x10a1   :  { %v1033_v40 = vmul.f32 %v1130_v39, %v1021_v18 }
0x10a3   :  { %1035 = vrot.lane.b32.xlu1 %v1033_v40, %s1182_s0 }
0x1115   :  { %v1036_v41 = vpop.permute.xlu1 %1035 }
0x1116   :  { %1039 = vst.msk [vmem:[#allocation5] sm:$0x1] %vm1038_vm6, %v1036_v41 }
0x1117   :  { %1162 = shalt.err (!%p1159_p9)
}
0x1118   :  { %1049 = dma.vmem_to_hbm [thread:$0]  %s1047_s21, 16, %s1485_s2, [#allocation4]  }
0x1119   :  { %1173 = dma.done.wait [#allocation4], 16  }
0x111a   :  { %1174 = vsyncadd [#allocation4], 4294967280 }
0x111b   :  { %1053 = vsyncpa [#allocation3], 1 }
0x111c   :  { %1054 = vsyncpa [#allocation4], 1 }

</bundles_post_ra>
